<compile_context>
chip_gen: v5e
topology: v5e:2x2
jax: 0.10.0
libtpu: 0.0.40
codegen_flags: <defaults>
</compile_context>

<pallas_src>
import functools

import jax
import jax.numpy as jnp
from jax.experimental import pallas as pl
from jax.experimental.pallas import tpu as pltpu


_BLOCK_BYTES = 4 * 1024 * 1024      # ~4 MiB per block (roofline plateau on v6e/v7x)
_VMEM_LIMIT = 32 * 1024 * 1024      # raises v5e's 16 MiB default; default on v6e/v7x

_HAS_TPU_PRNG = hasattr(pltpu, "prng_seed") and hasattr(pltpu, "stateful_normal")


def _noise_prng_kernel(seed_ref, x_ref, o_ref, *, mean, std):
    """y = x + (mean + std * N(0,1)); noise drawn on-chip, no extra HBM stream."""
    # Distinct PRNG stream per grid block.
    pltpu.prng_seed(seed_ref[0] + pl.program_id(0))
    n = pltpu.stateful_normal(x_ref.shape, jnp.float32)
    y = x_ref[...].astype(jnp.float32) + (mean + std * n)
    o_ref[...] = y.astype(o_ref.dtype)


def _add_kernel(x_ref, n_ref, o_ref):
    # Fallback path: pure streaming elementwise add (noise drawn in wrapper).
    o_ref[...] = x_ref[...] + n_ref[...]


def _lane_dense_factorization(total):
    """Pick (rows, cols, pad) with cols a multiple of 128 (unmasked stores)."""
    for cols in (4096, 2048, 1024, 512, 256, 128):
        if total % cols == 0:
            return total // cols, cols, 0
    # Lane-narrow total: pad the flattened array to a lane-dense slab and
    # slice the tail off the output (padded tail traffic is negligible).
    cols = 1024
    padded = -(-total // cols) * cols
    return padded // cols, cols, padded - total


def _pick_tile_rows(rows, cols, itemsize):
    """Byte-budgeted row tile, multiple of 8 sublanes (or the full extent)."""
    t = max(1, _BLOCK_BYTES // max(1, cols * itemsize))
    t = max(8, (t // 8) * 8)
    return rows if rows <= t else t


def noise_masking(x, key, *, mean=0.0, std=1.0):
    """y = x + N(mean, std) elementwise (mirrors NoiseMasking.forward)."""
    if not jnp.issubdtype(x.dtype, jnp.floating):
        raise TypeError("noise_masking expects a floating-point input")

    orig_shape = x.shape
    total = x.size
    itemsize = jnp.dtype(x.dtype).itemsize

    rows, cols, pad = _lane_dense_factorization(total)
    x_flat = x.reshape(-1)
    if pad:
        x_flat = jnp.pad(x_flat, (0, pad))
    x2d = x_flat.reshape(rows, cols)

    tile_r = _pick_tile_rows(rows, cols, itemsize)
    grid = (pl.cdiv(rows, tile_r),)

    compiler_params = pltpu.CompilerParams(
        dimension_semantics=("parallel",),
        vmem_limit_bytes=_VMEM_LIMIT,
    )

    use_onchip_prng = _HAS_TPU_PRNG and jax.default_backend() == "tpu"

    if use_onchip_prng:
        # Derive a 32-bit seed for the hardware PRNG from the JAX key.
        seed = jax.random.randint(
            key, (1,), 0, jnp.iinfo(jnp.int32).max, dtype=jnp.int32)
        kernel = functools.partial(
            _noise_prng_kernel, mean=float(mean), std=float(std))
        out2d = pl.pallas_call(
            kernel,
            out_shape=jax.ShapeDtypeStruct((rows, cols), x.dtype),
            grid_spec=pltpu.PrefetchScalarGridSpec(
                num_scalar_prefetch=1,
                grid=grid,
                in_specs=[pl.BlockSpec((tile_r, cols),
                                       lambda i, seed_ref: (i, 0))],
                out_specs=pl.BlockSpec((tile_r, cols),
                                       lambda i, seed_ref: (i, 0)),
            ),
            compiler_params=compiler_params,
            cost_estimate=pl.CostEstimate(
                flops=2 * total,
                transcendentals=total,
                bytes_accessed=2 * total * itemsize,   # read x + write y only
            ),
        )(seed, x2d)
    else:
        # CPU / interpret fallback: draw noise in the wrapper, directly in
        # x.dtype with mean/std folded in (no separate cast pass).
        noise = jax.random.normal(key, (rows, cols), dtype=jnp.float32)
        noise = (float(mean) + float(std) * noise).astype(x.dtype)
        out2d = pl.pallas_call(
            _add_kernel,
            out_shape=jax.ShapeDtypeStruct((rows, cols), x.dtype),
            grid=grid,
            in_specs=[
                pl.BlockSpec((tile_r, cols), lambda i: (i, 0)),
                pl.BlockSpec((tile_r, cols), lambda i: (i, 0)),
            ],
            out_specs=pl.BlockSpec((tile_r, cols), lambda i: (i, 0)),
            compiler_params=compiler_params,
            cost_estimate=pl.CostEstimate(
                flops=total,
                transcendentals=0,
                bytes_accessed=3 * total * itemsize,
            ),
        )(x2d, noise)

    out_flat = out2d.reshape(-1)
    if pad:
        out_flat = out_flat[:total]
    return out_flat.reshape(orig_shape)


if __name__ == "__main__":
    # Deterministic "config": cfg.mean, cfg.std
    MEAN, STD = 0.0, 0.5

    key = jax.random.PRNGKey(0)
    kx, kn = jax.random.split(key)
    x = jax.random.normal(kx, (2, 4, 16, 16), dtype=jnp.float32)  # NCHW

    y = jax.block_until_ready(noise_masking(x, kn, mean=MEAN, std=STD))

    # Sanity checks: shape/dtype preserved, noise actually added, right stats.
    assert y.shape == x.shape and y.dtype == x.dtype
    diff = y - x
    assert bool(jnp.any(jnp.abs(diff) > 0.0))
    assert abs(float(jnp.mean(diff)) - MEAN) < 0.15   # 2048 samples
    assert abs(float(jnp.std(diff)) - STD) < 0.2

    print("KERNEL_OK")
</pallas_src>

<mosaic_0001>
module attributes {stable_mosaic.version = 11 : i64} {
  func.func @_add_kernel(%arg0: i32, %arg1: memref<1x2048xf32, #tpu.memory_space<vmem>>, %arg2: memref<1x2048xf32, #tpu.memory_space<vmem>>, %arg3: memref<1x2048xf32, #tpu.memory_space<vmem>>) attributes {dimension_semantics = [#tpu.dimension_semantics<parallel>], iteration_bounds = array<i64: 1>, scalar_prefetch = 0 : i64, scratch_operands = 0 : i64, tpu.core_type = #tpu.core_type<tc>, window_params = [{transform_indices = @transform_0, window_bounds = array<i64: 1, 2048>}, {transform_indices = @transform_1, window_bounds = array<i64: 1, 2048>}, {transform_indices = @transform_2, window_bounds = array<i64: 1, 2048>}]} {
    %c0 = arith.constant 0 : index
    %c0_0 = arith.constant 0 : index
    %0 = vector.load %arg1[%c0, %c0_0] : memref<1x2048xf32, #tpu.memory_space<vmem>>, vector<1x2048xf32>
    %c0_1 = arith.constant 0 : index
    %c0_2 = arith.constant 0 : index
    %1 = vector.load %arg2[%c0_1, %c0_2] : memref<1x2048xf32, #tpu.memory_space<vmem>>, vector<1x2048xf32>
    %2 = arith.addf %0, %1 : vector<1x2048xf32>
    %c0_3 = arith.constant 0 : index
    %c0_4 = arith.constant 0 : index
    %3 = vector.load %arg3[%c0_3, %c0_4] : memref<1x2048xf32, #tpu.memory_space<vmem>>, vector<1x2048xf32>
    tpu.vector_store %arg3[%c0_3, %c0_4], %2 {strides = array<i32>} : memref<1x2048xf32, #tpu.memory_space<vmem>>, vector<1x2048xf32>,
    return
  }
  func.func @transform_0(%arg0: i32) -> (i32, i32) {
    %c0_i32 = arith.constant 0 : i32
    %c0_i32_0 = arith.constant 0 : i32
    return %arg0, %c0_i32 : i32, i32
  }
  func.func @transform_1(%arg0: i32) -> (i32, i32) {
    %c0_i32 = arith.constant 0 : i32
    %c0_i32_0 = arith.constant 0 : i32
    return %arg0, %c0_i32 : i32, i32
  }
  func.func @transform_2(%arg0: i32) -> (i32, i32) {
    %c0_i32 = arith.constant 0 : i32
    %c0_i32_0 = arith.constant 0 : i32
    return %arg0, %c0_i32 : i32, i32
  }
}

</mosaic_0001>

<bundles_post_ra>
// kernel: tpu_custom_call.1
= control target key start
LH: loop header
LB: loop body
LE: loop exit
PB: predicated region body
PF: predicated region fallthrough
CT: control target
= control target key end

     0   :  { %7 = vsyncpa [#allocation3], 0  ;;  %s174_s0 = inlined_call_operand.hbm [shape: f32[1,2048], index: 0, kind: input, shape index: {}]   ;;  %s175_s1 = inlined_call_operand.hbm [shape: f32[1,2048], index: 1, kind: input, shape index: {}]   ;;  %s176_s2 = inlined_call_operand.hbm [shape: f32[1,2048], index: 2, kind: output, shape index: {}]  }
   0x1   :  { %8 = vsyncpa [#allocation6], 0 }
   0x2   :  { %9 = vsyncpa [#allocation4], 0  ;;  %s15_s11 = sshll.u32 %s174_s0, 4  ;;  %s147_s12 = smov [#allocation2]   ;;  %s16_s11 = int_to_ptr.hbm [resolvable:$true] %s15_s11 }
   0x3   :  { %s17_s13 = sshll.u32 %s147_s12, 4  ;;  %s26_s16 = sshll.u32 %s175_s1, 4  ;;  %s18_s13 = int_to_ptr.vmem [resolvable:$true] %s17_s13  ;;  %s27_s16 = int_to_ptr.hbm [resolvable:$true] %s26_s16 }
   0x4   :  { %20 = dma.hbm_to_vmem [thread:$0]  %s16_s11, 256, %s18_s13, [#allocation3]  }
   0x5   :  { %s148_s17 = smov [#allocation5]  }
   0x6   :  { %s28_s18 = sshll.u32 %s148_s17, 4  ;;  %s29_s18 = int_to_ptr.vmem [resolvable:$true] %s28_s18 }
   0x7   :  { %31 = dma.hbm_to_vmem [thread:$0]  %s27_s16, 256, %s29_s18, [#allocation6]  }
   0x8   :  { %141 = dma.done.wait [#allocation3], 256  }
   0x9   :  { %142 = vsyncadd [#allocation3], 4294967040 }
   0xa   :  { %143 = dma.done.wait [#allocation6], 256  }
   0xb   :  { %144 = vsyncadd [#allocation6], 4294967040  ;;  %s149_s19 = smov [#allocation7]   ;;  %s55_s22 = sshll.u32 %s176_s2, 4  ;;  %v40_v0 = vld [vmem:[#allocation2] sm:$0xff]  ;;  %v42_v1 = vld [vmem:[#allocation5] sm:$0xff]  ;;  %s56_s22 = int_to_ptr.hbm [resolvable:$true] %s55_s22 }
   0xc   :  { %s53_s0 = sshll.u32 %s149_s19, 4  ;;  %v41_v2 = vld [vmem:[#allocation2 + $0x8] sm:$0xff]  ;;  %v44_v3 = vadd.f32 %v42_v1, %v40_v0  ;;  %v43_v4 = vld [vmem:[#allocation5 + $0x8] sm:$0xff]  ;;  %s54_s0 = int_to_ptr.vmem [resolvable:$true] %s53_s0 }
   0xd   :  { %v45_v5 = vadd.f32 %v43_v4, %v41_v2 }
   0xe   :  { %46 = vst [vmem:[#allocation7] sm:$0xff] %v44_v3 }
   0xf   :  { %47 = vst [vmem:[#allocation7 + $0x8] sm:$0xff] %v45_v5 }
  0x10   :  { %58 = dma.vmem_to_hbm [thread:$0]  %s54_s0, 256, %s56_s22, [#allocation4]  }
  0x11   :  { %145 = dma.done.wait [#allocation4], 256  }
  0x12   :  { %146 = vsyncadd [#allocation4], 4294967040 }
  0x13   :  { %63 = vsyncpa [#allocation3], 1 }
  0x14   :  { %64 = vsyncpa [#allocation6], 1 }
  0x15   :  { %65 = vsyncpa [#allocation4], 1 }

</bundles_post_ra>
